<compile_context>
chip_gen: v7x
topology: tpu7x:2x2x1
jax: 0.10.0
libtpu: 0.0.40
codegen_flags: <defaults>
</compile_context>

<pallas_src>
import functools
from typing import NamedTuple

import numpy as np
import jax
import jax.numpy as jnp
from jax import lax
from jax.experimental import pallas as pl
from jax.experimental.pallas import tpu as pltpu

BN_EPS = 1e-5
_LANE = 128


def _round_up(n, m):
    return ((n + m - 1) // m) * m


class VAEMeta(NamedTuple):
    layer_rows: tuple      # matmul K-dim (rows sliced from the weight slab) per layer
    layer_offs: tuple      # 128-aligned column offset of each layer in the slab
    layer_pcols: tuple     # lane-padded output width per layer
    layer_relu: tuple      # ReLU epilogue flag per layer
    bias_row: int          # row index of the bias row inside the slab
    latent_layer: int      # index of the convert_to_latent Linear
    latent_dim: int
    lat_pad: int           # padded latent slab width (== layer_pcols[latent_layer])
    in_width: int          # C_in * L_in of the input slab
    out_valid: int         # C_out * L_out of the reconstruction
    out_channels: int
    out_len: int


# ----------------------------------------------------------------------------
# One-time parameter prep: block-Toeplitz matrices + BN fold + single slab pack
# ----------------------------------------------------------------------------
def prepare_params(params, *, kernel_size, pad_enc, dec_pads, latent_dim,
                   in_channels, in_len):
    K = kernel_size

    def conv_toeplitz(w, L_in, pad):
        # Conv1d weight (Cout, Cin, K); rows are i*L_in + t_in (PyTorch C*L order).
        Cout, Cin, _ = w.shape
        L_out = L_in + 2 * pad - K + 1
        T = np.zeros((Cin * L_in, Cout * L_out), np.float32)
        for o in range(Cout):
            for i in range(Cin):
                for t_out in range(L_out):
                    for k in range(K):
                        t_in = t_out + k - pad
                        if 0 <= t_in < L_in:
                            T[i * L_in + t_in, o * L_out + t_out] = w[o, i, k]
        return T, L_out

    def convT_toeplitz(w, L_in, pad):
        # ConvTranspose1d weight (Cin, Cout, K), stride 1.
        Cin, Cout, _ = w.shape
        L_out = L_in + K - 1 - 2 * pad
        T = np.zeros((Cin * L_in, Cout * L_out), np.float32)
        for i in range(Cin):
            for o in range(Cout):
                for t_in in range(L_in):
                    for k in range(K):
                        t_out = t_in + k - pad
                        if 0 <= t_out < L_out:
                            T[i * L_in + t_in, o * L_out + t_out] = w[i, o, k]
        return T, L_out

    mats, biases, relus = [], [], []

    # Encoder Conv1d blocks with folded inference-mode BatchNorm.
    L = in_len
    for blk in params["enc_blocks"]:
        w = np.asarray(blk["w"], np.float32)
        scale = np.asarray(blk["gamma"], np.float32) / np.sqrt(
            np.asarray(blk["var"], np.float32) + BN_EPS)
        T, L_out = conv_toeplitz(w * scale[:, None, None], L, pad_enc)
        shift = ((np.asarray(blk["b"], np.float32)
                  - np.asarray(blk["mean"], np.float32)) * scale
                 + np.asarray(blk["beta"], np.float32))
        mats.append(T)
        biases.append(np.repeat(shift, L_out))        # bias[o*L_out + t] = shift[o]
        relus.append(True)
        L = L_out
    assert mats[0].shape[0] == in_channels * in_len

    # convert_to_latent Linear  (flat C*L order matches our slab layout).
    Wl = np.asarray(params["latent_w"], np.float32)    # (2*latent, Cl*Ll)
    mats.append(np.ascontiguousarray(Wl.T))
    biases.append(np.asarray(params["latent_b"], np.float32))
    relus.append(False)
    latent_layer = len(mats) - 1
    lat_pad = _round_up(2 * latent_dim, _LANE)

    # z_to_decoder Linear.  Rows are duplicated at [0:ld] and [ld:2ld] so the
    # in-kernel reparametrization slab  [mean | eps*std | 0...]  feeds it
    # directly:  W(mean) + W(eps*std) = W(z).
    Wz = np.asarray(params["dec_lin_w"], np.float32)   # (Cl*Ll, latent)
    Tz = np.zeros((lat_pad, Wz.shape[0]), np.float32)
    Tz[0:latent_dim, :] = Wz.T
    Tz[latent_dim:2 * latent_dim, :] = Wz.T
    mats.append(Tz)
    biases.append(np.asarray(params["dec_lin_b"], np.float32))
    relus.append(False)

    # Decoder ConvTranspose1d blocks.
    for blk, p in zip(params["dec_blocks"], dec_pads):
        w = np.asarray(blk["w"], np.float32)
        T, L_out = convT_toeplitz(w, L, p)
        mats.append(T)
        biases.append(np.repeat(np.asarray(blk["b"], np.float32), L_out))
        relus.append(False)
        L = L_out
    out_channels = int(np.asarray(params["dec_blocks"][-1]["w"]).shape[1])
    out_len = L
    assert out_channels == in_channels and out_len == in_len

    # ---- pack everything into ONE slab at (8,128)-aligned offsets -----------
    pcols = [_round_up(m.shape[1], _LANE) for m in mats]
    offs = [0]
    for p in pcols[:-1]:
        offs.append(offs[-1] + p)
    total_w = sum(pcols)

    # matmul K-dim per layer: layer 0 consumes the raw input slab, layer i>0
    # consumes the previous layer's lane-padded slab (extra rows are zero).
    rows = [mats[0].shape[0]] + [pcols[li - 1] for li in range(1, len(mats))]
    for m, r in zip(mats, rows):
        assert m.shape[0] <= r
    assert pcols[latent_layer] == lat_pad and rows[latent_layer + 1] == lat_pad

    w_rows = max(rows)
    bias_row = _round_up(w_rows, 8)
    slab = np.zeros((bias_row + 8, total_w), np.float32)
    for li, (m, b) in enumerate(zip(mats, biases)):
        r, c = m.shape
        slab[0:r, offs[li]:offs[li] + c] = m
        slab[bias_row, offs[li]:offs[li] + c] = b

    meta = VAEMeta(
        layer_rows=tuple(int(r) for r in rows),
        layer_offs=tuple(int(o) for o in offs),
        layer_pcols=tuple(int(p) for p in pcols),
        layer_relu=tuple(bool(r) for r in relus),
        bias_row=int(bias_row),
        latent_layer=int(latent_layer),
        latent_dim=int(latent_dim),
        lat_pad=int(lat_pad),
        in_width=int(mats[0].shape[0]),
        out_valid=int(mats[-1].shape[1]),
        out_channels=out_channels,
        out_len=out_len,
    )
    return jnp.asarray(slab), meta


# ----------------------------------------------------------------------------
# Fused forward pass: one grid-less pallas_call for the whole VAE
# ----------------------------------------------------------------------------
def _vae_kernel(x_ref, eps_ref, p_ref, lat_ref, xrec_ref, *, meta):
    act = x_ref[...]                                   # (B, Cin*Lin) f32 slab
    for li in range(len(meta.layer_rows)):
        rows = meta.layer_rows[li]
        off = meta.layer_offs[li]
        pc = meta.layer_pcols[li]
        w = p_ref[0:rows, off:off + pc]                # static, lane-aligned slice
        b = p_ref[meta.bias_row:meta.bias_row + 1, off:off + pc]
        act = jnp.dot(act, w, preferred_element_type=jnp.float32) + b
        if meta.layer_relu[li]:
            act = jnp.maximum(act, 0.0)
        if li == meta.latent_layer:
            # act = [mean | log_var | 0...]; emit packed latent, then build the
            # reparametrization proxy slab [mean | eps*std | 0...] which the
            # row-duplicated z_to_decoder matrix consumes directly.
            lat_ref[...] = act
            ld = meta.latent_dim
            lane = lax.broadcasted_iota(jnp.int32, act.shape, dimension=1)
            mean_only = jnp.where(lane < ld, act, 0.0)
            log_var_only = jnp.where((lane >= ld) & (lane < 2 * ld), act, 0.0)
            act = mean_only + eps_ref[...] * jnp.exp(0.5 * log_var_only)
    xrec_ref[...] = act                                # lane-dense (B, 256) store


def vae_forward(param_slab, x, y, eps, *, meta):
    del y                                              # unused (as in PyTorch forward)
    B = x.shape[0]
    x_slab = x.reshape(B, meta.in_width)               # PyTorch (B, C*L) order; free
    eps_slab = jnp.pad(eps, ((0, 0), (meta.latent_dim,
                                      meta.lat_pad - 2 * meta.latent_dim)))
    vmem = pl.BlockSpec(memory_space=pltpu.MemorySpace.VMEM)
    lat_slab, xrec_slab = pl.pallas_call(
        functools.partial(_vae_kernel, meta=meta),
        out_shape=(jax.ShapeDtypeStruct((B, meta.lat_pad), jnp.float32),
                   jax.ShapeDtypeStruct((B, meta.layer_pcols[-1]), jnp.float32)),
        in_specs=[vmem, vmem, vmem],
        out_specs=(vmem, vmem),
        # NOTE(v7x): for large B, add a leading "parallel" grid axis over batch
        # tiles (multiples of 8 rows per core) so both TensorCores are used.
    )(x_slab, eps_slab, param_slab)
    mean = lat_slab[:, :meta.latent_dim]
    log_var = lat_slab[:, meta.latent_dim:2 * meta.latent_dim]
    x_rec = xrec_slab[:, :meta.out_valid].reshape(B, meta.out_channels, meta.out_len)
    return x_rec, mean, log_var


# ----------------------------------------------------------------------------
# Deterministic parameter construction (shapes from Encoder/Decoder __init__)
# ----------------------------------------------------------------------------
def init_params(key, first_filter_size, kernel_size, depth, latent_dim_exp,
                in_channels=20, in_len=9):
    K = kernel_size
    latent_dim = 2 ** latent_dim_exp
    pad_enc = K // 2 - 1
    filter_number = [2 ** i for i in range(first_filter_size + 1)]
    enc_filters = list(reversed(filter_number))[:depth]       # e.g. [32, 16]
    dec_filters = list(reversed(filter_number[-depth:]))      # e.g. [32, 16]

    def uni(k, shape, bound):
        return jax.random.uniform(k, shape, jnp.float32, -bound, bound)

    enc_blocks = []
    in_ch = in_channels
    for out_ch in enc_filters:
        key, k1, k2, k3, k4, k5, k6 = jax.random.split(key, 7)
        bound = 1.0 / np.sqrt(in_ch * K)
        enc_blocks.append(dict(
            w=uni(k1, (out_ch, in_ch, K), bound),
            b=uni(k2, (out_ch,), bound),
            gamma=jax.random.uniform(k3, (out_ch,), jnp.float32, 0.5, 1.5),
            beta=jax.random.uniform(k4, (out_ch,), jnp.float32, -0.5, 0.5),
            mean=jax.random.uniform(k5, (out_ch,), jnp.float32, -0.1, 0.1),
            var=jax.random.uniform(k6, (out_ch,), jnp.float32, 0.5, 1.5)))
        in_ch = out_ch

    last_filter_size = enc_filters[-1]
    last_feature_size = 10 - (depth * 2 + 1)
    last_dim = last_filter_size * last_feature_size

    key, k1, k2 = jax.random.split(key, 3)
    bound = 1.0 / np.sqrt(last_dim)
    latent_w = uni(k1, (2 * latent_dim, last_dim), bound)
    latent_b = uni(k2, (2 * latent_dim,), bound)

    key, k1, k2 = jax.random.split(key, 3)
    bound = 1.0 / np.sqrt(latent_dim)
    dec_lin_w = uni(k1, (last_dim, latent_dim), bound)
    dec_lin_b = uni(k2, (last_dim,), bound)

    dec_blocks, dec_pads = [], []
    n_dec = depth + 1
    for i in range(n_dec):
        if i == 0:
            in_ch, out_ch, p = last_filter_size, dec_filters[0], pad_enc
        elif i == n_dec - 1:
            in_ch, out_ch, p = dec_filters[-1], in_channels, pad_enc + 1
        else:
            in_ch, out_ch, p = dec_filters[i - 1], dec_filters[i], pad_enc
        key, k1, k2 = jax.random.split(key, 3)
        bound = 1.0 / np.sqrt(in_ch * K)
        dec_blocks.append(dict(w=uni(k1, (in_ch, out_ch, K), bound),
                               b=uni(k2, (out_ch,), bound)))
        dec_pads.append(p)

    params = dict(enc_blocks=enc_blocks, latent_w=latent_w, latent_b=latent_b,
                  dec_lin_w=dec_lin_w, dec_lin_b=dec_lin_b, dec_blocks=dec_blocks)
    hp = dict(kernel_size=K, pad_enc=pad_enc, dec_pads=tuple(dec_pads),
              latent_dim=latent_dim, in_channels=in_channels, in_len=in_len)
    return params, hp


# ----------------------------------------------------------------------------
# Pure-JAX f32 reference (same inference-mode semantics) for a sanity check
# ----------------------------------------------------------------------------
def reference_forward(params, hp, x, eps):
    K, p_enc, ld = hp["kernel_size"], hp["pad_enc"], hp["latent_dim"]
    hi = lax.Precision.HIGHEST
    a = x
    for blk in params["enc_blocks"]:
        ap = jnp.pad(a, ((0, 0), (0, 0), (p_enc, p_enc)))
        conv = lax.conv_general_dilated(ap, blk["w"], (1,), "VALID",
                                        dimension_numbers=("NCH", "OIH", "NCH"),
                                        precision=hi) + blk["b"][None, :, None]
        bn = ((conv - blk["mean"][None, :, None])
              / jnp.sqrt(blk["var"][None, :, None] + BN_EPS)
              * blk["gamma"][None, :, None] + blk["beta"][None, :, None])
        a = jnp.maximum(bn, 0.0)
    B = a.shape[0]
    flat = a.reshape(B, -1)                                  # PyTorch (B, C*L) order
    latent = jnp.dot(flat, params["latent_w"].T, precision=hi) + params["latent_b"]
    mean, log_var = latent[:, :ld], latent[:, ld:]
    z = mean + eps * jnp.exp(0.5 * log_var)
    d = (jnp.dot(z, params["dec_lin_w"].T, precision=hi)
         + params["dec_lin_b"]).reshape(B, a.shape[1], a.shape[2])
    for blk, p in zip(params["dec_blocks"], hp["dec_pads"]):
        w_conv = jnp.flip(blk["w"], axis=2).transpose(1, 0, 2)  # (O, I, K)
        q = K - 1 - p
        dp = jnp.pad(d, ((0, 0), (0, 0), (q, q)))
        d = lax.conv_general_dilated(dp, w_conv, (1,), "VALID",
                                     dimension_numbers=("NCH", "OIH", "NCH"),
                                     precision=hi) + blk["b"][None, :, None]
    return d, mean, log_var


# ----------------------------------------------------------------------------
if __name__ == "__main__":
    # Geometry implied by the module: input (B, 20, 9), kernel_size=5,
    # padding=5//2-1=1 shrinks L by 2 per encoder block so that after depth=2
    # blocks L == 10-(2*depth+1)=5; the decoder mirrors it back to 9.
    first_filter_size, kernel_size, depth, latent_dim_exp = 5, 5, 2, 3
    B = 8      # multiple of 8 -> fills all vreg sublanes (perf feedback)

    key = jax.random.PRNGKey(0)
    key, kx, ky, keps, kp = jax.random.split(key, 5)
    params, hp = init_params(kp, first_filter_size, kernel_size, depth,
                             latent_dim_exp)

    x = jax.random.normal(kx, (B, hp["in_channels"], hp["in_len"]), jnp.float32)
    y = jax.random.normal(ky, (B, 3), jnp.float32)        # unused by forward()
    eps = jax.random.normal(keps, (B, hp["latent_dim"]), jnp.float32)

    param_slab, meta = prepare_params(params, **hp)       # one-time weight prep

    fwd = jax.jit(vae_forward, static_argnames=("meta",))
    x_rec, mean, log_var = fwd(param_slab, x, y, eps, meta=meta)
    jax.block_until_ready((x_rec, mean, log_var))

    x_rec_r, mean_r, lv_r = reference_forward(params, hp, x, eps)

    tol = dict(rtol=1e-3, atol=1e-4)                      # all-f32 path
    np.testing.assert_allclose(np.asarray(mean), np.asarray(mean_r), **tol)
    np.testing.assert_allclose(np.asarray(log_var), np.asarray(lv_r), **tol)
    np.testing.assert_allclose(np.asarray(x_rec), np.asarray(x_rec_r), **tol)

    assert x_rec.shape == (B, hp["in_channels"], hp["in_len"])
    assert mean.shape == (B, hp["latent_dim"])
    assert log_var.shape == (B, hp["latent_dim"])
    print("KERNEL_OK")
</pallas_src>

<mosaic_0001>
module attributes {stable_mosaic.version = 11 : i64} {
  func.func @_vae_kernel(%arg0: memref<8x180xf32, #tpu.memory_space<vmem>>, %arg1: memref<8x128xf32, #tpu.memory_space<vmem>>, %arg2: memref<264x1408xf32, #tpu.memory_space<vmem>>, %arg3: memref<8x128xf32, #tpu.memory_space<vmem>>, %arg4: memref<8x256xf32, #tpu.memory_space<vmem>>) attributes {dimension_semantics = [], scalar_prefetch = 0 : i64, scratch_operands = 0 : i64, tpu.core_type = #tpu.core_type<tc>} {
    %c0 = arith.constant 0 : index
    %c0_0 = arith.constant 0 : index
    %0 = vector.load %arg0[%c0, %c0_0] : memref<8x180xf32, #tpu.memory_space<vmem>>, vector<8x180xf32>
    %c0_1 = arith.constant 0 : index
    %c0_2 = arith.constant 0 : index
    %1 = vector.load %arg2[%c0_1, %c0_2] : memref<264x1408xf32, #tpu.memory_space<vmem>>, vector<180x256xf32>
    %c256 = arith.constant 256 : index
    %c0_3 = arith.constant 0 : index
    %2 = vector.load %arg2[%c256, %c0_3] : memref<264x1408xf32, #tpu.memory_space<vmem>>, vector<1x256xf32>
    %cst = arith.constant dense<0.000000e+00> : vector<8x256xf32>
    %3 = tpu.matmul %0, %1, %cst {dimension_numbers = #tpu.dot_dimension_numbers<[1], [0], [0], [1], [0, 0, 1, 1], [], []>} : vector<8x180xf32>, vector<180x256xf32>, vector<8x256xf32> -> vector<8x256xf32>
    %4 = vector.broadcast %2 : vector<1x256xf32> to vector<8x256xf32>
    %5 = arith.addf %3, %4 : vector<8x256xf32>
    %cst_4 = arith.constant 0.000000e+00 : f32
    %6 = vector.broadcast %cst_4 : f32 to vector<8x256xf32>
    %7 = arith.maximumf %5, %6 : vector<8x256xf32>
    %c0_5 = arith.constant 0 : index
    %c256_6 = arith.constant 256 : index
    %8 = vector.load %arg2[%c0_5, %c256_6] : memref<264x1408xf32, #tpu.memory_space<vmem>>, vector<256x128xf32>
    %c256_7 = arith.constant 256 : index
    %c256_8 = arith.constant 256 : index
    %9 = vector.load %arg2[%c256_7, %c256_8] : memref<264x1408xf32, #tpu.memory_space<vmem>>, vector<1x128xf32>
    %cst_9 = arith.constant dense<0.000000e+00> : vector<8x128xf32>
    %10 = tpu.matmul %7, %8, %cst_9 {dimension_numbers = #tpu.dot_dimension_numbers<[1], [0], [0], [1], [0, 0, 1, 1], [], []>} : vector<8x256xf32>, vector<256x128xf32>, vector<8x128xf32> -> vector<8x128xf32>
    %11 = vector.broadcast %9 : vector<1x128xf32> to vector<8x128xf32>
    %12 = arith.addf %10, %11 : vector<8x128xf32>
    %cst_10 = arith.constant 0.000000e+00 : f32
    %13 = vector.broadcast %cst_10 : f32 to vector<8x128xf32>
    %14 = arith.maximumf %12, %13 : vector<8x128xf32>
    %c0_11 = arith.constant 0 : index
    %c384 = arith.constant 384 : index
    %15 = vector.load %arg2[%c0_11, %c384] : memref<264x1408xf32, #tpu.memory_space<vmem>>, vector<128x128xf32>
    %c256_12 = arith.constant 256 : index
    %c384_13 = arith.constant 384 : index
    %16 = vector.load %arg2[%c256_12, %c384_13] : memref<264x1408xf32, #tpu.memory_space<vmem>>, vector<1x128xf32>
    %cst_14 = arith.constant dense<0.000000e+00> : vector<8x128xf32>
    %17 = tpu.matmul %14, %15, %cst_14 {dimension_numbers = #tpu.dot_dimension_numbers<[1], [0], [0], [1], [0, 0, 1, 1], [], []>} : vector<8x128xf32>, vector<128x128xf32>, vector<8x128xf32> -> vector<8x128xf32>
    %18 = vector.broadcast %16 : vector<1x128xf32> to vector<8x128xf32>
    %19 = arith.addf %17, %18 : vector<8x128xf32>
    %c0_15 = arith.constant 0 : index
    %c0_16 = arith.constant 0 : index
    %20 = vector.load %arg3[%c0_15, %c0_16] : memref<8x128xf32, #tpu.memory_space<vmem>>, vector<8x128xf32>
    tpu.vector_store %arg3[%c0_15, %c0_16], %19 {strides = array<i32>} : memref<8x128xf32, #tpu.memory_space<vmem>>, vector<8x128xf32>,
    %21 = tpu.iota {dimensions = array<i32: 1>} : vector<8x128xi32>
    %c8_i32 = arith.constant 8 : i32
    %22 = vector.broadcast %c8_i32 : i32 to vector<8x128xi32>
    %23 = arith.cmpi slt, %21, %22 : vector<8x128xi32>
    %cst_17 = arith.constant 0.000000e+00 : f32
    %24 = vector.broadcast %cst_17 : f32 to vector<8x128xf32>
    %25 = arith.select %23, %19, %24 : vector<8x128xi1>, vector<8x128xf32>
    %c8_i32_18 = arith.constant 8 : i32
    %26 = vector.broadcast %c8_i32_18 : i32 to vector<8x128xi32>
    %27 = arith.cmpi sge, %21, %26 : vector<8x128xi32>
    %c16_i32 = arith.constant 16 : i32
    %28 = vector.broadcast %c16_i32 : i32 to vector<8x128xi32>
    %29 = arith.cmpi slt, %21, %28 : vector<8x128xi32>
    %30 = arith.andi %27, %29 : vector<8x128xi1>
    %cst_19 = arith.constant 0.000000e+00 : f32
    %31 = vector.broadcast %cst_19 : f32 to vector<8x128xf32>
    %32 = arith.select %30, %19, %31 : vector<8x128xi1>, vector<8x128xf32>
    %c0_20 = arith.constant 0 : index
    %c0_21 = arith.constant 0 : index
    %33 = vector.load %arg1[%c0_20, %c0_21] : memref<8x128xf32, #tpu.memory_space<vmem>>, vector<8x128xf32>
    %cst_22 = arith.constant 5.000000e-01 : f32
    %34 = vector.broadcast %cst_22 : f32 to vector<8x128xf32>
    %35 = arith.mulf %34, %32 : vector<8x128xf32>
    %36 = math.exp %35 : vector<8x128xf32>
    %37 = arith.mulf %33, %36 : vector<8x128xf32>
    %38 = arith.addf %25, %37 : vector<8x128xf32>
    %c0_23 = arith.constant 0 : index
    %c512 = arith.constant 512 : index
    %39 = vector.load %arg2[%c0_23, %c512] : memref<264x1408xf32, #tpu.memory_space<vmem>>, vector<128x128xf32>
    %c256_24 = arith.constant 256 : index
    %c512_25 = arith.constant 512 : index
    %40 = vector.load %arg2[%c256_24, %c512_25] : memref<264x1408xf32, #tpu.memory_space<vmem>>, vector<1x128xf32>
    %cst_26 = arith.constant dense<0.000000e+00> : vector<8x128xf32>
    %41 = tpu.matmul %38, %39, %cst_26 {dimension_numbers = #tpu.dot_dimension_numbers<[1], [0], [0], [1], [0, 0, 1, 1], [], []>} : vector<8x128xf32>, vector<128x128xf32>, vector<8x128xf32> -> vector<8x128xf32>
    %42 = vector.broadcast %40 : vector<1x128xf32> to vector<8x128xf32>
    %43 = arith.addf %41, %42 : vector<8x128xf32>
    %c0_27 = arith.constant 0 : index
    %c640 = arith.constant 640 : index
    %44 = vector.load %arg2[%c0_27, %c640] : memref<264x1408xf32, #tpu.memory_space<vmem>>, vector<128x256xf32>
    %c256_28 = arith.constant 256 : index
    %c640_29 = arith.constant 640 : index
    %45 = vector.load %arg2[%c256_28, %c640_29] : memref<264x1408xf32, #tpu.memory_space<vmem>>, vector<1x256xf32>
    %cst_30 = arith.constant dense<0.000000e+00> : vector<8x256xf32>
    %46 = tpu.matmul %43, %44, %cst_30 {dimension_numbers = #tpu.dot_dimension_numbers<[1], [0], [0], [1], [0, 0, 1, 1], [], []>} : vector<8x128xf32>, vector<128x256xf32>, vector<8x256xf32> -> vector<8x256xf32>
    %47 = vector.broadcast %45 : vector<1x256xf32> to vector<8x256xf32>
    %48 = arith.addf %46, %47 : vector<8x256xf32>
    %c0_31 = arith.constant 0 : index
    %c896 = arith.constant 896 : index
    %49 = vector.load %arg2[%c0_31, %c896] : memref<264x1408xf32, #tpu.memory_space<vmem>>, vector<256x256xf32>
    %c256_32 = arith.constant 256 : index
    %c896_33 = arith.constant 896 : index
    %50 = vector.load %arg2[%c256_32, %c896_33] : memref<264x1408xf32, #tpu.memory_space<vmem>>, vector<1x256xf32>
    %cst_34 = arith.constant dense<0.000000e+00> : vector<8x256xf32>
    %51 = tpu.matmul %48, %49, %cst_34 {dimension_numbers = #tpu.dot_dimension_numbers<[1], [0], [0], [1], [0, 0, 1, 1], [], []>} : vector<8x256xf32>, vector<256x256xf32>, vector<8x256xf32> -> vector<8x256xf32>
    %52 = vector.broadcast %50 : vector<1x256xf32> to vector<8x256xf32>
    %53 = arith.addf %51, %52 : vector<8x256xf32>
    %c0_35 = arith.constant 0 : index
    %c1152 = arith.constant 1152 : index
    %54 = vector.load %arg2[%c0_35, %c1152] : memref<264x1408xf32, #tpu.memory_space<vmem>>, vector<256x256xf32>
    %c256_36 = arith.constant 256 : index
    %c1152_37 = arith.constant 1152 : index
    %55 = vector.load %arg2[%c256_36, %c1152_37] : memref<264x1408xf32, #tpu.memory_space<vmem>>, vector<1x256xf32>
    %cst_38 = arith.constant dense<0.000000e+00> : vector<8x256xf32>
    %56 = tpu.matmul %53, %54, %cst_38 {dimension_numbers = #tpu.dot_dimension_numbers<[1], [0], [0], [1], [0, 0, 1, 1], [], []>} : vector<8x256xf32>, vector<256x256xf32>, vector<8x256xf32> -> vector<8x256xf32>
    %57 = vector.broadcast %55 : vector<1x256xf32> to vector<8x256xf32>
    %58 = arith.addf %56, %57 : vector<8x256xf32>
    %c0_39 = arith.constant 0 : index
    %c0_40 = arith.constant 0 : index
    %59 = vector.load %arg4[%c0_39, %c0_40] : memref<8x256xf32, #tpu.memory_space<vmem>>, vector<8x256xf32>
    tpu.vector_store %arg4[%c0_39, %c0_40], %58 {strides = array<i32>} : memref<8x256xf32, #tpu.memory_space<vmem>>, vector<8x256xf32>,
    return
  }
}

</mosaic_0001>

<bundles_post_ra>
// kernel: vae_forward.1
= control target key start
LH: loop header
LB: loop body
LE: loop exit
PB: predicated region body
PF: predicated region fallthrough
CT: control target
= control target key end

     0   :  { %10 = vsyncpa [#allocation3], 0  ;;  %s1349_s15 = smov [#allocation2]   ;;  %s1440_s0 = inlined_call_operand.vmem [shape: f32[8,180], index: 0, kind: input, shape index: {}]   ;;  %s1441_s1 = inlined_call_operand.vmem [shape: f32[8,128], index: 1, kind: input, shape index: {}]   ;;  %s1442_s2 = inlined_call_operand.hbm [shape: f32[264,1408], index: 2, kind: input, shape index: {}]   ;;  %s1443_s3 = inlined_call_operand.vmem [shape: f32[8,128], index: 3, kind: output, shape index: {0}]   ;;  %s1444_s4 = inlined_call_operand.vmem [shape: f32[8,256], index: 4, kind: output, shape index: {1}]  }
   0x1   :  { %s20_s16 = sshll.u32 %s1349_s15, 4  ;;  %s1325_s19 = scalar_lea.hbm %s1442_s2, 46464  ;;  %s21_s16 = int_to_ptr.vmem [resolvable:$true] %s20_s16 }
   0x2   :  { %p1326_p0 = scmp.ne.s32.totalorder %s1442_s2, %s1325_s19  ;;  %p1329_p1 = scmp.lt.u32.totalorder %s1325_s19, %s1442_s2 }
   0x4   :  { %p1331_p2 = pnand %p1329_p1, %p1326_p0 }
   0x6   :  { %1334 = shalt.err (!%p1331_p2)
}
   0x7   :  { %s1335_s24 = scalar_lea.vmem %s21_s16, 46464  ;;  %p1340_p4 = scmp.lt.s32.totalorder %s21_s16, %s21_s16 }
   0x8   :  { %p1336_p3 = scmp.ne.s32.totalorder %s21_s16, %s1335_s24  ;;  %p1341_p5 = scmp.lt.s32.totalorder %s1335_s24, %s1335_s24 }
   0xa   :  { %p1342_p6 = por %p1341_p5, %p1340_p4 }
   0xc   :  { %p1343_p7 = pnand %p1342_p6, %p1336_p3 }
   0xe   :  { %1346 = shalt.err (!%p1343_p7)
}
   0xf   :  { %s1350_s25 = smov 1408   ;;  %s1351_s26 = smov 88  }
  0x10   :  { %26 = dma.hbm_to_vmem [thread:$0]  %s1442_s2, 46464, %s21_s16, [#allocation3], %s1350_s25, %s1350_s25, %s1351_s26  }
  0x11   :  { %1347 = dma.done.wait [#allocation3], 46464  }
  0x12   :  { %1348 = vsyncadd [#allocation3], 4294920832  ;;  %v33_v0 = vld [vmem:[#allocation2 + $0x8] sm:$0xff]  ;;  %v35_v1 = vld [vmem:[#allocation2 + $0x60] sm:$0xff]  ;;  %vm91_vm0 = vcmask 424960   ;;  %vm95_vm1 = vcmask 1043456  }
  0x13   :  { %v32_v2 = vld [vmem:[#allocation2] sm:$0xff]  ;;  %v1033_v3 = vpack.c.bf16 %v35_v1, %v33_v0  ;;  %v34_v4 = vld [vmem:[#allocation2 + $0x58] sm:$0xff]  ;;  %v39_v6 = vld [vmem:[#allocation2 + $0x110] sm:$0xff]  ;;  %vm1353_vm2 = vmmov 0  }
  0x14   :  { %v37_v5 = vld [vmem:[#allocation2 + $0xb8] sm:$0xff]  ;;  %v1035_v7 = vpack.c.bf16 %v34_v4, %v32_v2  ;;  %v36_v9 = vld [vmem:[#allocation2 + $0xb0] sm:$0xff]  ;;  %v38_v10 = vld [vmem:[#allocation2 + $0x108] sm:$0xff] }
  0x15   :  { %v1037_v8 = vpack.c.bf16 %v39_v6, %v37_v5  ;;  %v41_v11 = vld [vmem:[#allocation2 + $0x168] sm:$0xff]  ;;  %1034 = vmatprep.subr.bf16.mxu0 %v1033_v3  ;;  %v43_v12 = vld [vmem:[#allocation2 + $0x1c0] sm:$0xff]  ;;  %v1039_v13 = vpack.c.bf16 %v38_v10, %v36_v9  ;;  %v42_v16 = vld [vmem:[#allocation2 + $0x1b8] sm:$0xff] }
  0x16   :  { %1036 = vmatpush1.bf16.msra.mxu0 %v1035_v7  ;;  %v1041_v14 = vpack.c.bf16 %v43_v12, %v41_v11  ;;  %v40_v15 = vld [vmem:[#allocation2 + $0x160] sm:$0xff]  ;;  %v45_v17 = vld [vmem:[#allocation2 + $0x218] sm:$0xff]  ;;  %v47_v18 = vld [vmem:[#allocation2 + $0x270] sm:$0xff] }
  0x17   :  { %1038 = vmatprep.subr.bf16.mxu0 %v1037_v8  ;;  %v1043_v19 = vpack.c.bf16 %v42_v16, %v40_v15  ;;  %v1045_v20 = vpack.c.bf16 %v47_v18, %v45_v17  ;;  %v44_v21 = vld [vmem:[#allocation2 + $0x210] sm:$0xff]  ;;  %v46_v22 = vld [vmem:[#allocation2 + $0x268] sm:$0xff]  ;;  %v51_v24 = vld [vmem:[#allocation2 + $0x320] sm:$0xff] }
  0x18   :  { %v49_v23 = vld [vmem:[#allocation2 + $0x2c8] sm:$0xff]  ;;  %v1047_v25 = vpack.c.bf16 %v46_v22, %v44_v21  ;;  %v48_v27 = vld [vmem:[#allocation2 + $0x2c0] sm:$0xff]  ;;  %v50_v28 = vld [vmem:[#allocation2 + $0x318] sm:$0xff] }
  0x19   :  { %v1049_v26 = vpack.c.bf16 %v51_v24, %v49_v23  ;;  %v53_v29 = vld [vmem:[#allocation2 + $0x378] sm:$0xff]  ;;  %v55_v30 = vld [vmem:[#allocation2 + $0x3d0] sm:$0xff]  ;;  %v54_v32 = vld [vmem:[#allocation2 + $0x3c8] sm:$0xff]  ;;  %v1051_v34 = vpack.c.bf16 %v50_v28, %v48_v27 }
  0x1a   :  { %1040 = vmatpush1.bf16.msra.mxu0 %v1039_v13  ;;  %v52_v31 = vld [vmem:[#allocation2 + $0x370] sm:$0xff]  ;;  %v31_v33 = vld [vmem:[%s1440_s0 + $0x8] sm:$0xff]  ;;  %v59_v36 = vld [vmem:[#allocation2 + $0x480] sm:$0xff]  ;;  %v1053_v40 = vpack.c.bf16 %v55_v30, %v53_v29 }
  0x1b   :  { %1042 = vmatprep.subr.bf16.mxu0 %v1041_v14  ;;  %v57_v35 = vld [vmem:[#allocation2 + $0x428] sm:$0xff]  ;;  %893 = vmatprep.mubr.msk.f32.mxu0 %vm91_vm0, %v31_v33  ;;  %v191_v37 = vld [vmem:[#allocation2 + $0x590] sm:$0xff]  ;;  %v193_v43 = vld [vmem:[#allocation2 + $0x640] sm:$0xff]  ;;  %v1055_v51 = vpack.c.bf16 %v54_v32, %v52_v31 }
  0x1c   :  { %v192_v38 = vld [vmem:[#allocation2 + $0x5e8] sm:$0xff]  ;;  %v175_v39 = vld [vmem:[#allocation2 + $0x10] sm:$0xff]  ;;  %v194_v44 = vld [vmem:[#allocation2 + $0x698] sm:$0xff]  ;;  %v1057_v55 = vpack.c.bf16 %v59_v36, %v57_v35 }
  0x1d   :  { %v1077_v41 = vpack.c.bf16 %v192_v38, %v191_v37  ;;  %v176_v42 = vld [vmem:[#allocation2 + $0x68] sm:$0xff]  ;;  %v1081_v46 = vpack.c.bf16 %v194_v44, %v193_v43  ;;  %v177_v47 = vld [vmem:[#allocation2 + $0xc0] sm:$0xff]  ;;  %v178_v48 = vld [vmem:[#allocation2 + $0x118] sm:$0xff] }
  0x1e   :  { %1044 = vmatpush1.bf16.msra.mxu0 %v1043_v19  ;;  %v1079_v45 = vpack.c.bf16 %v176_v42, %v175_v39  ;;  %v195_v49 = vld [vmem:[#allocation2 + $0x6f0] sm:$0xff]  ;;  %v196_v50 = vld [vmem:[#allocation2 + $0x748] sm:$0xff]  ;;  %v56_v52 = vld [vmem:[#allocation2 + $0x420] sm:$0xff]  ;;  %v1083_v54 = vpack.c.bf16 %v178_v48, %v177_v47 }
  0x1f   :  { %1046 = vmatprep.subr.bf16.mxu0 %v1045_v20  ;;  %1078 = vmatprep.subr.bf16.mxu1 %v1077_v41  ;;  %v58_v53 = vld [vmem:[#allocation2 + $0x478] sm:$0xff]  ;;  %v1085_v57 = vpack.c.bf16 %v196_v50, %v195_v49  ;;  %v179_v58 = vld [vmem:[#allocation2 + $0x170] sm:$0xff]  ;;  %v180_v59 = vld [vmem:[#allocation2 + $0x1c8] sm:$0xff] }
  0x20   :  { %1080 = vmatpush3.bf16.msra.mxu1 %v1079_v45  ;;  %v61_v56 = vld [vmem:[#allocation2 + $0x4d8] sm:$0xff]  ;;  %v63_v60 = vld [vmem:[#allocation2 + $0x530] sm:$0xff]  ;;  %v197_v61 = vld [vmem:[#allocation2 + $0x7a0] sm:$0xff]  ;;  %v1059_v63 = vpack.c.bf16 %v58_v53, %v56_v52  ;;  %v1087_v2 = vpack.c.bf16 %v180_v59, %v179_v58 }
  0x21   :  { %1082 = vmatprep.subr.bf16.mxu1 %v1081_v46  ;;  %v198_v62 = vld [vmem:[#allocation2 + $0x7f8] sm:$0xff]  ;;  %v60_v0 = vld [vmem:[#allocation2 + $0x4d0] sm:$0xff]  ;;  %v62_v1 = vld [vmem:[#allocation2 + $0x528] sm:$0xff]  ;;  %v1061_v3 = vpack.c.bf16 %v63_v60, %v61_v56 }
  0x22   :  { %1048 = vmatpush1.bf16.msra.mxu0 %v1047_v25  ;;  %v65_v4 = vld [vmem:[#allocation2 + $0x588] sm:$0xff]  ;;  %v1089_v5 = vpack.c.bf16 %v198_v62, %v197_v61  ;;  %v181_v6 = vld [vmem:[#allocation2 + $0x220] sm:$0xff]  ;;  %v182_v7 = vld [vmem:[#allocation2 + $0x278] sm:$0xff]  ;;  %v1063_v11 = vpack.c.bf16 %v62_v1, %v60_v0 }
  0x23   :  { %1050 = vmatprep.subr.bf16.mxu0 %v1049_v26  ;;  %v67_v8 = vld [vmem:[#allocation2 + $0x5e0] sm:$0xff]  ;;  %v199_v9 = vld [vmem:[#allocation2 + $0x850] sm:$0xff]  ;;  %v200_v10 = vld [vmem:[#allocation2 + $0x8a8] sm:$0xff]  ;;  %v1091_v14 = vpack.c.bf16 %v182_v7, %v181_v6 }
  0x24   :  { %1084 = vmatpush3.bf16.msra.mxu1 %v1083_v54  ;;  %v64_v12 = vld [vmem:[#allocation2 + $0x580] sm:$0xff]  ;;  %v66_v13 = vld [vmem:[#allocation2 + $0x5d8] sm:$0xff]  ;;  %v1065_v15 = vpack.c.bf16 %v67_v8, %v65_v4  ;;  %v1093_v17 = vpack.c.bf16 %v200_v10, %v199_v9  ;;  %v183_v18 = vld [vmem:[#allocation2 + $0x2d0] sm:$0xff]  ;;  %v1352_v54 = vmov 0.0|0.0  }
  0x25   :  { %1086 = vmatprep.subr.bf16.mxu1 %v1085_v57  ;;  %v69_v16 = vld [vmem:[#allocation2 + $0x638] sm:$0xff]  ;;  %v184_v19 = vld [vmem:[#allocation2 + $0x328] sm:$0xff]  ;;  %v71_v20 = vld [vmem:[#allocation2 + $0x690] sm:$0xff]  ;;  %v1067_v23 = vpack.c.bf16 %v66_v13, %v64_v12 }
  0x26   :  { %1052 = vmatpush1.bf16.msra.mxu0 %v1051_v34  ;;  %v201_v21 = vld [vmem:[#allocation2 + $0x900] sm:$0xff]  ;;  %v202_v22 = vld [vmem:[#allocation2 + $0x958] sm:$0xff]  ;;  %v68_v24 = vld [vmem:[#allocation2 + $0x630] sm:$0xff]  ;;  %v1095_v26 = vpack.c.bf16 %v184_v19, %v183_v18  ;;  %v1069_v27 = vpack.c.bf16 %v71_v20, %v69_v16 }
  0x27   :  { %1054 = vmatprep.subr.bf16.mxu0 %v1053_v40  ;;  %v70_v25 = vld [vmem:[#allocation2 + $0x688] sm:$0xff]  ;;  %v1097_v29 = vpack.c.bf16 %v202_v22, %v201_v21  ;;  %v185_v30 = vld [vmem:[#allocation2 + $0x380] sm:$0xff]  ;;  %v186_v31 = vld [vmem:[#allocation2 + $0x3d8] sm:$0xff] }
  0x28   :  { %1088 = vmatpush3.bf16.msra.mxu1 %v1087_v2  ;;  %v73_v28 = vld [vmem:[#allocation2 + $0x6e8] sm:$0xff]  ;;  %v75_v32 = vld [vmem:[#allocation2 + $0x740] sm:$0xff]  ;;  %v203_v33 = vld [vmem:[#allocation2 + $0x9b0] sm:$0xff]  ;;  %v1071_v35 = vpack.c.bf16 %v70_v25, %v68_v24  ;;  %v1099_v36 = vpack.c.bf16 %v186_v31, %v185_v30 }
  0x29   :  { %1090 = vmatprep.subr.bf16.mxu1 %v1089_v5  ;;  %v204_v34 = vld [vmem:[#allocation2 + $0xa08] sm:$0xff]  ;;  %v1073_v37 = vpack.c.bf16 %v75_v32, %v73_v28  ;;  %v72_v38 = vld [vmem:[#allocation2 + $0x6e0] sm:$0xff]  ;;  %v74_v39 = vld [vmem:[#allocation2 + $0x738] sm:$0xff]  ;;  %v1354_v28 = vmov 0.0  }
  0x2a   :  { %1056 = vmatpush1.bf16.msra.mxu0 %v1055_v51  ;;  %v1101_v40 = vpack.c.bf16 %v204_v34, %v203_v33  ;;  %v1075_v41 = vpack.c.bf16 %v74_v39, %v72_v38  ;;  %v77_v42 = vld [vmem:[#allocation2 + $0x798] sm:$0xf]  ;;  %v76_v43 = vld [vmem:[#allocation2 + $0x790] sm:$0xf]  ;;  %v30_v44 = vld [vmem:[%s1440_s0] sm:$0xff] }
  0x2b   :  { %1058 = vmatprep.subr.bf16.mxu0 %v1057_v55  ;;  %v187_v45 = vld [vmem:[#allocation2 + $0x430] sm:$0xff]  ;;  %v188_v46 = vld [vmem:[#allocation2 + $0x488] sm:$0xff]  ;;  %v205_v48 = vld [vmem:[#allocation2 + $0xa60] sm:$0xff]  ;;  %v81_v55 = vlaneseq }
  0x2c   :  { %1092 = vmatpush3.bf16.msra.mxu1 %v1091_v14  ;;  %v1103_v47 = vpack.c.bf16 %v188_v46, %v187_v45  ;;  %v206_v49 = vld [vmem:[#allocation2 + $0xab8] sm:$0xff]  ;;  %v189_v51 = vld [vmem:[#allocation2 + $0x4e0] sm:$0xff]  ;;  %v280_v2 = vld [vmem:[#allocation2 + $0x70] sm:$0xff] }
  0x2d   :  { %1094 = vmatprep.subr.bf16.mxu1 %v1093_v17  ;;  %v1105_v50 = vpack.c.bf16 %v206_v49, %v205_v48  ;;  %v190_v52 = vld [vmem:[#allocation2 + $0x538] sm:$0xff]  ;;  %v82_v56 = vshrl.u32 %v81_v55, 7  ;;  %v79_v58 = vld [vmem:[#allocation2 + $0xb00] ss:$8 sm:$0x3]  ;;  %v288_v17 = vld [vmem:[#allocation2 + $0x330] sm:$0xff] }
  0x2e   :  { %1060 = vmatpush1.bf16.msra.mxu0 %v1059_v63  ;;  %v1107_v53 = vpack.c.bf16 %v190_v52, %v189_v51  ;;  %v279_v1 = vld [vmem:[#allocation2 + $0x18] sm:$0xff]  ;;  %v281_v7 = vld [vmem:[#allocation2 + $0xc8] sm:$0xff]  ;;  %v282_v8 = vld [vmem:[#allocation2 + $0x120] sm:$0xff] }
  0x2f   :  { %1062 = vmatprep.subr.bf16.mxu0 %v1061_v3  ;;  %v1401_v57 = vsub.s32 0, %v82_v56  ;;  %v1403_v59 = vsub.s32 1, %v82_v56  ;;  %v1110_v5 = vpack.c.bf16 %v280_v2, %v279_v1  ;;  %v1113_v9 = vpack.c.bf16 %v282_v8, %v281_v7  ;;  %v283_v10 = vld [vmem:[#allocation2 + $0x178] sm:$0xff]  ;;  %v285_v13 = vld [vmem:[#allocation2 + $0x228] sm:$0xff]  ;;  %v286_v14 = vld [vmem:[#allocation2 + $0x280] sm:$0xff] }
  0x30   :  { %1096 = vmatpush3.bf16.msra.mxu1 %v1095_v26  ;;  %v287_v16 = vld [vmem:[#allocation2 + $0x2d8] sm:$0xff]  ;;  %v289_v19 = vld [vmem:[#allocation2 + $0x388] sm:$0xff]  ;;  %v290_v20 = vld [vmem:[#allocation2 + $0x3e0] sm:$0xff] }
  0x31   :  { %1098 = vmatprep.subr.bf16.mxu1 %v1097_v29  ;;  %v84_v60 = vrot.slane %v79_v58, %v1401_v57  ;;  %v88_v61 = vrot.slane %v79_v58, %v1403_v59  ;;  %v1122_v18 = vpack.c.bf16 %v288_v17, %v287_v16  ;;  %v1125_v21 = vpack.c.bf16 %v290_v20, %v289_v19  ;;  %v291_v22 = vld [vmem:[#allocation2 + $0x438] sm:$0xff]  ;;  %v293_v25 = vld [vmem:[#allocation2 + $0x4e8] sm:$0xff]  ;;  %v294_v26 = vld [vmem:[#allocation2 + $0x540] sm:$0xff] }
  0x32   :  { %1064 = vmatpush1.bf16.msra.mxu0 %v1063_v11  ;;  %v284_v11 = vld [vmem:[#allocation2 + $0x1d0] sm:$0xff]  ;;  %v381_v29 = vld [vmem:[#allocation2 + $0x20] sm:$0xff]  ;;  %v382_v30 = vld [vmem:[#allocation2 + $0x78] sm:$0xff] }
  0x33   :  { %1066 = vmatprep.subr.bf16.mxu0 %v1065_v15  ;;  %v1116_v12 = vpack.c.bf16 %v284_v11, %v283_v10  ;;  %v1119_v15 = vpack.c.bf16 %v286_v14, %v285_v13  ;;  %v383_v31 = vld [vmem:[#allocation2 + $0xd0] sm:$0xff]  ;;  %v1134_v32 = vpack.c.bf16 %v382_v30, %v381_v29  ;;  %v384_v33 = vld [vmem:[#allocation2 + $0x128] sm:$0xff]  ;;  %v390_v48 = vld [vmem:[#allocation2 + $0x338] sm:$0xff] }
  0x34   :  { %1100 = vmatpush3.bf16.msra.mxu1 %v1099_v36  ;;  %v1137_v34 = vpack.c.bf16 %v384_v33, %v383_v31  ;;  %v207_v36 = vld [vmem:[#allocation2 + $0xb10] ss:$0 sm:$0xff]  ;;  %v388_v45 = vld [vmem:[#allocation2 + $0x288] sm:$0xff]  ;;  %v394_v56 = vld [vmem:[#allocation2 + $0x498] sm:$0xff] }
  0x35   :  { %1102 = vmatprep.subr.bf16.mxu1 %v1101_v40  ;;  %v392_v51 = vld [vmem:[#allocation2 + $0x3e8] sm:$0xff]  ;;  %v472_v8 = vld [vmem:[#allocation2 + $0xd8] sm:$0xff]  ;;  %v477_v10 = vld [vmem:[#allocation2 + $0x190] sm:$0xff] }
  0x36   :  { %1068 = vmatpush1.bf16.msra.mxu0 %v1067_v23  ;;  %v292_v23 = vld [vmem:[#allocation2 + $0x490] sm:$0xff]  ;;  %v468_v1 = vld [vmem:[#allocation2 + $0x28] sm:$0xff]  ;;  %v478_v14 = vld [vmem:[#allocation2 + $0x1e0] sm:$0xff] }
  0x37   :  { %1070 = vmatprep.subr.bf16.mxu0 %v1069_v27  ;;  %v1128_v24 = vpack.c.bf16 %v292_v23, %v291_v22  ;;  %v1131_v27 = vpack.c.bf16 %v294_v26, %v293_v25  ;;  %v479_v11 = vld [vmem:[#allocation2 + $0x1e8] sm:$0xff]  ;;  %v483_v16 = vld [vmem:[#allocation2 + $0x298] sm:$0xff]  ;;  %v482_v20 = vld [vmem:[#allocation2 + $0x290] sm:$0xff] }
  0x38   :  { %1104 = vmatpush3.bf16.msra.mxu1 %v1103_v47  ;;  %v389_v47 = vld [vmem:[#allocation2 + $0x2e0] sm:$0xff]  ;;  %v476_v13 = vld [vmem:[#allocation2 + $0x188] sm:$0xff]  ;;  %v480_v19 = vld [vmem:[#allocation2 + $0x238] sm:$0xff] }
  0x39   :  { %1106 = vmatprep.subr.bf16.mxu1 %v1105_v50  ;;  %v1146_v49 = vpack.c.bf16 %v390_v48, %v389_v47  ;;  %v391_v50 = vld [vmem:[#allocation2 + $0x390] sm:$0xff]  ;;  %v1167_v17 = vpack.c.bf16 %v478_v14, %v476_v13  ;;  %v487_v22 = vld [vmem:[#allocation2 + $0x348] sm:$0xff]  ;;  %v1171_v23 = vpack.c.bf16 %v482_v20, %v480_v19  ;;  %v486_v26 = vld [vmem:[#allocation2 + $0x340] sm:$0xff] }
  0x3a   :  { %1072 = vmatpush1.bf16.msra.mxu0 %v1071_v35  ;;  %v1149_v52 = vpack.c.bf16 %v392_v51, %v391_v50  ;;  %v484_v25 = vld [vmem:[#allocation2 + $0x2e8] sm:$0xff]  ;;  %v488_v31 = vld [vmem:[#allocation2 + $0x398] sm:$0xff]  ;;  %v493_v33 = vld [vmem:[#allocation2 + $0x450] sm:$0xff] }
  0x3b   :  { %1074 = vmatprep.subr.bf16.mxu0 %v1073_v37  ;;  %v1175_v29 = vpack.c.bf16 %v486_v26, %v484_v25  ;;  %v375_v51 = vld [vmem:[%s1441_s1] sm:$0xff]  ;;  %v594_v13 = vld [vmem:[#allocation2 + $0x1f0] sm:$0xff] }
  0x3c   :  { %1108 = vmatpush3.bf16.msra.mxu1 %v1107_v53  ;;  %v393_v53 = vld [vmem:[#allocation2 + $0x440] sm:$0xff]  ;;  %v597_v14 = vld [vmem:[#allocation2 + $0x250] sm:$0xff] }
  0x3d   :  { %1109 = vmatprep.subr.bf16.mxu1 %v1352_v54  ;;  %v1152_v58 = vpack.c.bf16 %v394_v56, %v393_v53  ;;  %v598_v19 = vld [vmem:[#allocation2 + $0x2a0] sm:$0xff]  ;;  %v602_v25 = vld [vmem:[#allocation2 + $0x350] sm:$0xff] }
  0x3e   :  { %1076 = vmatpush1.bf16.msra.mxu0 %v1075_v41  ;;  %v385_v41 = vld [vmem:[#allocation2 + $0x180] sm:$0xff]  ;;  %v605_v26 = vld [vmem:[#allocation2 + $0x3b0] sm:$0xff] }
  0x3f   :  { %891 = vmatprep.subr.msk.mxu0 %vm95_vm1, %v77_v42  ;;  %v386_v42 = vld [vmem:[#allocation2 + $0x1d8] sm:$0xff]  ;;  %v601_v20 = vld [vmem:[#allocation2 + $0x300] sm:$0xff] }
  0x42   :  { %892 = vmatpush1.msk.msra.mxu0 %vm95_vm1, %v76_v43  ;;  %v1140_v43 = vpack.c.bf16 %v386_v42, %v385_v41 }
  0x43   :  { %167 = vmatmul.mubr.f32.vlgmr.msra.gmra.mrb[0].mxu0 %v30_v44  ;;  %1133 = vmatprep.subr.bf16.mxu0 %v1352_v54  ;;  %v387_v44 = vld [vmem:[#allocation2 + $0x230] sm:$0xff] }
  0x44   :  { %1030 = vmatprep.mubr.msk.f32.mxu0 %vm1353_vm2, %v1354_v28  ;;  %1135 = vmatpush3.bf16.msra.mxu0 %v1134_v32  ;;  %v1143_v46 = vpack.c.bf16 %v388_v45, %v387_v44  ;;  %v490_v32 = vld [vmem:[#allocation2 + $0x3f0] sm:$0xff]  ;;  %v295_v44 = vld [vmem:[#allocation2 + $0xb18] ss:$0 sm:$0xff] }
  0x45   :  { %1136 = vmatprep.subr.bf16.mxu0 %v1352_v54 }
  0x48   :  { %1138 = vmatpush3.bf16.msra.mxu0 %v1137_v34  ;;  %v495_v34 = vld [vmem:[#allocation2 + $0x4a8] sm:$0xff] }
  0x49   :  { %1139 = vmatprep.subr.bf16.mxu0 %v1352_v54 }
  0x4c   :  { %1141 = vmatpush3.bf16.msra.mxu0 %v1140_v43  ;;  %v368_v43 = vand.u32 127, %v81_v55 }
  0x4d   :  { %1142 = vmatprep.subr.bf16.mxu0 %v1352_v54 }
  0x4e   :  { %vm371_vm3 = vcmp.ge.s32.totalorder %v368_v43, 8  ;;  %vm372_vm4 = vcmp.lt.s32.totalorder %v368_v43, 16  ;;  %vm369_vm6 = vcmp.lt.s32.totalorder %v368_v43, 8  ;;  %v614_v43 = vld [vmem:[#allocation2 + $0x560] sm:$0xff] }
  0x4f   :  { %vm373_vm5 = vmand %vm371_vm3, %vm372_vm4 }
  0x50   :  { %1144 = vmatpush3.bf16.msra.mxu0 %v1143_v46 }
  0x51   :  { %1145 = vmatprep.subr.bf16.mxu0 %v1352_v54 }
  0x54   :  { %1147 = vmatpush3.bf16.msra.mxu0 %v1146_v49 }
  0x55   :  { %1148 = vmatprep.subr.bf16.mxu0 %v1352_v54 }
  0x58   :  { %1150 = vmatpush3.bf16.msra.mxu0 %v1149_v52 }
  0x59   :  { %1151 = vmatprep.subr.bf16.mxu0 %v1352_v54 }
  0x5c   :  { %1153 = vmatpush3.bf16.msra.mxu0 %v1152_v58  ;;  %v496_v58 = vld [vmem:[#allocation2 + $0x4f8] sm:$0xff] }
  0x5d   :  { %1154 = vmatprep.subr.bf16.mxu0 %v1352_v54 }
 0x116   :  { %v168_v62 = vpop.f32.mrb[0].mxu0 }
 0x117   :  { %v169_v63 = vadd.f32 %v168_v62, %v84_v60  ;;  %v170_v0 = vpop.f32.mrb[1].mxu0  ;;  %v395_v60 = vld [vmem:[#allocation2 + $0x4f0] sm:$0xff] }
 0x118   :  { %v171_v3 = vadd.f32 %v170_v0, %v88_v61  ;;  %v396_v61 = vld [vmem:[#allocation2 + $0x548] sm:$0xff] }
 0x119   :  { %v173_v6 = vmax.f32 %v169_v63, 0.0  ;;  %v1155_v62 = vpack.c.bf16 %v396_v61, %v395_v60  ;;  %v469_v63 = vld [vmem:[#allocation2 + $0x30] sm:$0xff]  ;;  %v471_v0 = vld [vmem:[#allocation2 + $0x88] sm:$0xff] }
 0x11a   :  { %v174_v4 = vmax.f32 %v171_v3, 0.0  ;;  %v1157_v2 = vpack.c.bf16 %v471_v0, %v469_v63  ;;  %v470_v3 = vld [vmem:[#allocation2 + $0x80] sm:$0xff]  ;;  %v498_v60 = vld [vmem:[#allocation2 + $0x550] sm:$0xff]  ;;  %v587_v63 = vld [vmem:[#allocation2 + $0x98] sm:$0xff] }
 0x11b   :  { %1156 = vmatpush3.bf16.msra.mxu0 %v1155_v62  ;;  %v1187_v61 = vpack.c.bf16 %v498_v60, %v496_v58  ;;  %v585_v62 = vld [vmem:[#allocation2 + $0x40] sm:$0xff]  ;;  %v584_v0 = vld [vmem:[#allocation2 + $0x38] sm:$0xff] }
 0x11c   :  { %272 = vmatprep.mubr.f32.mxu1 %v174_v4  ;;  %v473_v4 = vld [vmem:[#allocation2 + $0xe0] sm:$0xff]  ;;  %v627_v60 = vld [vmem:[#allocation2 + $0x778] sm:$0xff] }
 0x11d   :  { %273 = vmatmul.mubr.f32.vlgmr.msra.gmra.mrb[0].mxu1 %v173_v6  ;;  %v1159_v6 = vpack.c.bf16 %v470_v3, %v468_v1  ;;  %v1189_v1 = vpack.c.bf16 %v587_v63, %v585_v62  ;;  %v589_v3 = vld [vmem:[#allocation2 + $0xf0] sm:$0xff]  ;;  %v625_v58 = vld [vmem:[#allocation2 + $0x720] sm:$0xff]  ;;  %v624_v63 = vld [vmem:[#allocation2 + $0x718] sm:$0xff] }
 0x11e   :  { %1111 = vmatpush3.bf16.msra.mxu1 %v1110_v5  ;;  %995 = vmatprep.mubr.msk.f32.mxu1 %vm1353_vm2, %v1354_v28  ;;  %v475_v5 = vld [vmem:[#allocation2 + $0x138] sm:$0xff]  ;;  %v1229_v62 = vpack.c.bf16 %v627_v60, %v625_v58  ;;  %v746_v60 = vld [vmem:[#allocation2 + $0x2b0] sm:$0xff] }
 0x11f   :  { %1112 = vmatprep.subr.bf16.mxu1 %v1352_v54  ;;  %v1161_v7 = vpack.c.bf16 %v475_v5, %v473_v4  ;;  %v591_v4 = vld [vmem:[#allocation2 + $0x148] sm:$0xff]  ;;  %1190 = vmatprep.subr.bf16.mxu0 %v1189_v1  ;;  %v629_v1 = vld [vmem:[#allocation2 + $0x7d0] sm:$0xff]  ;;  %v744_v58 = vld [vmem:[#allocation2 + $0x258] sm:$0xff] }
 0x122   :  { %1114 = vmatpush3.bf16.msra.mxu1 %v1113_v9  ;;  %v474_v9 = vld [vmem:[#allocation2 + $0x130] sm:$0xff] }
 0x123   :  { %1115 = vmatprep.subr.bf16.mxu1 %v1352_v54 }
 0x126   :  { %1117 = vmatpush3.bf16.msra.mxu1 %v1116_v12  ;;  %v1165_v12 = vpack.c.bf16 %v479_v11, %v477_v10  ;;  %v595_v10 = vld [vmem:[#allocation2 + $0x1f8] sm:$0xff] }
 0x127   :  { %1118 = vmatprep.subr.bf16.mxu1 %v1352_v54 }
 0x12a   :  { %1120 = vmatpush3.bf16.msra.mxu1 %v1119_v15  ;;  %v481_v15 = vld [vmem:[#allocation2 + $0x240] sm:$0xff] }
 0x12b   :  { %1121 = vmatprep.subr.bf16.mxu1 %v1352_v54 }
 0x12e   :  { %1123 = vmatpush3.bf16.msra.mxu1 %v1122_v18  ;;  %v1169_v18 = vpack.c.bf16 %v483_v16, %v481_v15  ;;  %v599_v15 = vld [vmem:[#allocation2 + $0x2a8] sm:$0xff] }
 0x12f   :  { %1124 = vmatprep.subr.bf16.mxu1 %v1352_v54 }
 0x132   :  { %1126 = vmatpush3.bf16.msra.mxu1 %v1125_v21  ;;  %v485_v21 = vld [vmem:[#allocation2 + $0x2f0] sm:$0xff] }
 0x133   :  { %1127 = vmatprep.subr.bf16.mxu1 %v1352_v54 }
 0x136   :  { %1129 = vmatpush3.bf16.msra.mxu1 %v1128_v24  ;;  %v1173_v24 = vpack.c.bf16 %v487_v22, %v485_v21  ;;  %v603_v21 = vld [vmem:[#allocation2 + $0x358] sm:$0xff] }
 0x137   :  { %1130 = vmatprep.subr.bf16.mxu1 %v1352_v54  ;;  %v1163_v54 = vpack.c.bf16 %v474_v9, %v472_v8  ;;  %v590_v8 = vld [vmem:[#allocation2 + $0x140] sm:$0xff] }
 0x138   :  { %v593_v9 = vld [vmem:[#allocation2 + $0x1a0] sm:$0xff] }
 0x13a   :  { %1132 = vmatpush3.bf16.msra.mxu1 %v1131_v27  ;;  %v489_v27 = vld [vmem:[#allocation2 + $0x3a0] sm:$0xff] }
 0x13b   :  { %1158 = vmatprep.subr.bf16.mxu1 %v1157_v2  ;;  %v586_v2 = vld [vmem:[#allocation2 + $0x90] sm:$0xff] }
 0x13c   :  { %v1191_v5 = vpack.c.bf16 %v586_v2, %v584_v0  ;;  %v626_v0 = vld [vmem:[#allocation2 + $0x770] sm:$0xff]  ;;  %v631_v2 = vld [vmem:[#allocation2 + $0x828] sm:$0xff] }
 0x1f0   :  { %v926_v35 = vpop.f32.mrb[0].mxu1 }
 0x1f1   :  { %v927_v37 = vpop.f32.mrb[1].mxu1 }
 0x1f2   :  { %v928_v38 = vadd.f32 %v927_v37, %v926_v35  ;;  %v1179_v35 = vpack.c.bf16 %v490_v32, %v488_v31  ;;  %v492_v37 = vld [vmem:[#allocation2 + $0x448] sm:$0xff]  ;;  %v606_v31 = vld [vmem:[#allocation2 + $0x400] sm:$0xff] }
 0x1f3   :  { %v609_v32 = vld [vmem:[#allocation2 + $0x460] sm:$0xff] }
 0x1f4   :  { %v275_v39 = vadd.f32 %v928_v38, %v207_v36  ;;  %v1181_v36 = vpack.c.bf16 %v495_v34, %v493_v33  ;;  %v494_v38 = vld [vmem:[#allocation2 + $0x4a0] sm:$0xff]  ;;  %v611_v33 = vld [vmem:[#allocation2 + $0x4b8] sm:$0xff] }
 0x1f5   :  { %v1183_v41 = vpack.c.bf16 %v494_v38, %v492_v37  ;;  %v610_v37 = vld [vmem:[#allocation2 + $0x4b0] sm:$0xff] }
 0x1f6   :  { %v278_v40 = vmax.f32 %v275_v39, 0.0  ;;  %v497_v39 = vld [vmem:[#allocation2 + $0x500] sm:$0xff]  ;;  %v613_v38 = vld [vmem:[#allocation2 + $0x510] sm:$0xff] }
 0x1f8   :  { %996 = vmatmul.mubr.f32.vlgmr.msra.gmra.mrb[2].mxu1 %v278_v40  ;;  %v499_v40 = vld [vmem:[#allocation2 + $0x558] sm:$0xff] }
 0x1f9   :  { %577 = vmatprep.mubr.f32.mxu1 %v1354_v28  ;;  %1160 = vmatpush1.bf16.msra.mxu1 %v1159_v6  ;;  %v491_v28 = vld [vmem:[#allocation2 + $0x3f8] sm:$0xff]  ;;  %v1185_v42 = vpack.c.bf16 %v499_v40, %v497_v39  ;;  %v1193_v6 = vpack.c.bf16 %v591_v4, %v589_v3  ;;  %v615_v39 = vld [vmem:[#allocation2 + $0x568] sm:$0xff]  ;;  %v1231_v3 = vpack.c.bf16 %v626_v0, %v624_v63 }
 0x1fa   :  { %1162 = vmatprep.subr.bf16.mxu1 %v1161_v7  ;;  %v1177_v30 = vpack.c.bf16 %v491_v28, %v489_v27  ;;  %v588_v7 = vld [vmem:[#allocation2 + $0xe8] sm:$0xff]  ;;  %v1233_v4 = vpack.c.bf16 %v631_v2, %v629_v1  ;;  %v1267_v63 = vpack.c.bf16 %v746_v60, %v744_v58  ;;  %v750_v2 = vld [vmem:[#allocation2 + $0x360] sm:$0xff]  ;;  %v789_v58 = vld [vmem:[#allocation2 + $0x9f0] sm:$0xff] }
 0x1fb   :  { %v1195_v11 = vpack.c.bf16 %v590_v8, %v588_v7  ;;  %v607_v27 = vld [vmem:[#allocation2 + $0x408] sm:$0xff]  ;;  %v633_v7 = vld [vmem:[#allocation2 + $0x880] sm:$0xff]  ;;  %v635_v8 = vld [vmem:[#allocation2 + $0x8d8] sm:$0xff] }
 0x1fc   :  { %v748_v1 = vld [vmem:[#allocation2 + $0x308] sm:$0xff] }
 0x1fd   :  { %1164 = vmatpush1.bf16.msra.mxu1 %v1163_v54  ;;  %v1197_v54 = vpack.c.bf16 %v595_v10, %v593_v9  ;;  %v1237_v10 = vpack.c.bf16 %v635_v8, %v633_v7  ;;  %v752_v7 = vld [vmem:[#allocation2 + $0x3b8] sm:$0xff]  ;;  %v754_v8 = vld [vmem:[#allocation2 + $0x410] sm:$0xff]  ;;  %v791_v60 = vld [vmem:[#allocation2 + $0xa48] sm:$0xff] }
 0x1fe   :  { %1166 = vmatprep.subr.bf16.mxu1 %v1165_v12  ;;  %v592_v12 = vld [vmem:[#allocation2 + $0x198] sm:$0xff] }
 0x1ff   :  { %v1199_v16 = vpack.c.bf16 %v594_v13, %v592_v12  ;;  %v637_v12 = vld [vmem:[#allocation2 + $0x930] sm:$0xff]  ;;  %v639_v13 = vld [vmem:[#allocation2 + $0x988] sm:$0xff] }
 0x201   :  { %1168 = vmatpush1.bf16.msra.mxu1 %v1167_v17  ;;  %v1201_v17 = vpack.c.bf16 %v599_v15, %v597_v14  ;;  %v1241_v15 = vpack.c.bf16 %v639_v13, %v637_v12  ;;  %v756_v12 = vld [vmem:[#allocation2 + $0x468] sm:$0xff]  ;;  %v758_v13 = vld [vmem:[#allocation2 + $0x4c0] sm:$0xff] }
 0x202   :  { %1170 = vmatprep.subr.bf16.mxu1 %v1169_v18  ;;  %v596_v18 = vld [vmem:[#allocation2 + $0x248] sm:$0xff] }
 0x203   :  { %v1203_v22 = vpack.c.bf16 %v598_v19, %v596_v18  ;;  %v641_v18 = vld [vmem:[#allocation2 + $0x9e0] sm:$0xff]  ;;  %v643_v19 = vld [vmem:[#allocation2 + $0xa38] sm:$0xff] }
 0x205   :  { %1172 = vmatpush1.bf16.msra.mxu1 %v1171_v23  ;;  %v1205_v23 = vpack.c.bf16 %v603_v21, %v601_v20  ;;  %v1245_v21 = vpack.c.bf16 %v643_v19, %v641_v18  ;;  %v760_v18 = vld [vmem:[#allocation2 + $0x518] sm:$0xff]  ;;  %v762_v19 = vld [vmem:[#allocation2 + $0x570] sm:$0xff] }
 0x206   :  { %1174 = vmatprep.subr.bf16.mxu1 %v1173_v24  ;;  %v600_v24 = vld [vmem:[#allocation2 + $0x2f8] sm:$0xff] }
 0x207   :  { %v1207_v28 = vpack.c.bf16 %v602_v25, %v600_v24  ;;  %v397_v25 = vld [vmem:[#allocation2 + $0xb20] ss:$0 sm:$0xff] }
 0x209   :  { %1176 = vmatpush1.bf16.msra.mxu1 %v1175_v29  ;;  %v1209_v29 = vpack.c.bf16 %v607_v27, %v605_v26 }
 0x20a   :  { %1178 = vmatprep.subr.bf16.mxu1 %v1177_v30  ;;  %v604_v30 = vld [vmem:[#allocation2 + $0x3a8] sm:$0xff] }
 0x20b   :  { %v1211_v34 = vpack.c.bf16 %v606_v31, %v604_v30  ;;  %v647_v30 = vld [vmem:[#allocation2 + $0xae8] sm:$0xff] }
 0x20d   :  { %1180 = vmatpush1.bf16.msra.mxu1 %v1179_v35  ;;  %v1213_v35 = vpack.c.bf16 %v611_v33, %v609_v32  ;;  %v644_v32 = vld [vmem:[#allocation2 + $0xa88] sm:$0xff]  ;;  %v646_v33 = vld [vmem:[#allocation2 + $0xae0] sm:$0xff] }
 0x20e   :  { %1182 = vmatprep.subr.bf16.mxu1 %v1181_v36  ;;  %v608_v36 = vld [vmem:[#allocation2 + $0x458] sm:$0xff] }
 0x20f   :  { %v1215_v40 = vpack.c.bf16 %v610_v37, %v608_v36  ;;  %v735_v36 = vld [vmem:[#allocation2 + $0xa8] sm:$0xff] }
 0x210   :  { %v732_v37 = vld [vmem:[#allocation2 + $0x48] sm:$0xff] }
 0x211   :  { %1184 = vmatpush1.bf16.msra.mxu1 %v1183_v41  ;;  %v1217_v41 = vpack.c.bf16 %v615_v39, %v613_v38  ;;  %v734_v39 = vld [vmem:[#allocation2 + $0xa0] sm:$0xff] }
 0x212   :  { %1186 = vmatprep.subr.bf16.mxu1 %v1185_v42  ;;  %v612_v42 = vld [vmem:[#allocation2 + $0x508] sm:$0xff] }
 0x215   :  { %1188 = vmatpush1.bf16.msra.mxu1 %v1187_v61 }
 0x2cb   :  { %v362_v45 = vpop.f32.mrb[2].mxu1 }
 0x2cc   :  { %v363_v46 = vadd.f32 %v362_v45, %v295_v44  ;;  %v997_v47 = vpop.f32.mrb[3].mxu1  ;;  %v617_v44 = vld [vmem:[#allocation2 + $0x5c0] sm:$0xff]  ;;  %v619_v45 = vld [vmem:[#allocation2 + $0x618] sm:$0xff] }
 0x2cd   :  { %v1221_v47 = vpack.c.bf16 %v619_v45, %v617_v44  ;;  %v736_v44 = vld [vmem:[#allocation2 + $0xf8] sm:$0xff]  ;;  %v738_v45 = vld [vmem:[#allocation2 + $0x150] sm:$0xff] }
 0x2ce   :  { %366 = vst [vmem:[%s1443_s3] sm:$0xff] %v363_v46  ;;  %v374_v48 = vsel %vm373_vm5, %v363_v46, 0.0  ;;  %v370_v53 = vsel %vm369_vm6, %v363_v46, 0.0  ;;  %v1219_v46 = vpack.c.bf16 %v614_v43, %v612_v42  ;;  %v1255_v42 = vpack.c.bf16 %v734_v39, %v732_v37  ;;  %v774_v37 = vld [vmem:[#allocation2 + $0x780] sm:$0xff]  ;;  %v779_v39 = vld [vmem:[#allocation2 + $0x838] sm:$0xff] }
 0x2cf   :  { %v376_v49 = vmul.f32 0.5, %v374_v48  ;;  %v616_v48 = vld [vmem:[#allocation2 + $0x5b8] sm:$0xff] }
 0x2d1   :  { %v377_v50 = vmul.f32 1.442695, %v376_v49  ;;  %v618_v49 = vld [vmem:[#allocation2 + $0x610] sm:$0xff] }
 0x2d3   :  { %1323 = vpow2.f32 %v377_v50  ;;  %v621_v50 = vld [vmem:[#allocation2 + $0x670] sm:$0xff] }
 0x2dd   :  { %v1324_v55 = vpop.eup %1323 }
 0x2de   :  { %v379_v52 = vmul.f32 %v1324_v55, %v375_v51  ;;  %v623_v51 = vld [vmem:[#allocation2 + $0x6c8] sm:$0xff]  ;;  %v1223_v55 = vpack.c.bf16 %v618_v49, %v616_v48  ;;  %v1259_v48 = vpack.c.bf16 %v738_v45, %v736_v44  ;;  %v781_v44 = vld [vmem:[#allocation2 + $0x890] sm:$0xff] }
 0x2df   :  { %v783_v45 = vld [vmem:[#allocation2 + $0x8e8] sm:$0xff] }
 0x2e0   :  { %v380_v56 = vadd.f32 %v379_v52, %v370_v53  ;;  %v1225_v52 = vpack.c.bf16 %v623_v51, %v621_v50  ;;  %v620_v53 = vld [vmem:[#allocation2 + $0x668] sm:$0xff]  ;;  %v742_v51 = vld [vmem:[#allocation2 + $0x200] sm:$0xff] }
 0x2e1   :  { %v740_v50 = vld [vmem:[#allocation2 + $0x1a8] sm:$0xff] }
 0x2e2   :  { %1031 = vmatmul.mubr.f32.vlgmr.msra.gmra.mrb[2].mxu0 %v380_v56  ;;  %v622_v56 = vld [vmem:[#allocation2 + $0x6c0] sm:$0xff] }
 0x2e3   :  { %1192 = vmatpush1.bf16.msra.mxu0 %v1191_v5  ;;  %v1227_v61 = vpack.c.bf16 %v622_v56, %v620_v53  ;;  %v628_v5 = vld [vmem:[#allocation2 + $0x7c8] sm:$0xff]  ;;  %v1263_v53 = vpack.c.bf16 %v742_v51, %v740_v50  ;;  %v785_v50 = vld [vmem:[#allocation2 + $0x940] sm:$0xff]  ;;  %v787_v51 = vld [vmem:[#allocation2 + $0x998] sm:$0xff] }
 0x2e4   :  { %1194 = vmatprep.subr.bf16.mxu0 %v1193_v6  ;;  %v630_v6 = vld [vmem:[#allocation2 + $0x820] sm:$0xff] }
 0x2e5   :  { %v1235_v9 = vpack.c.bf16 %v630_v6, %v628_v5  ;;  %v1271_v5 = vpack.c.bf16 %v750_v2, %v748_v1  ;;  %v501_v2 = vld [vmem:[#allocation2 + $0xb28] ss:$8 sm:$0x3] }
 0x2e7   :  { %1196 = vmatpush1.bf16.msra.mxu0 %v1195_v11  ;;  %v632_v11 = vld [vmem:[#allocation2 + $0x878] sm:$0xff] }
 0x2e8   :  { %1198 = vmatprep.subr.bf16.mxu0 %v1197_v54  ;;  %v634_v54 = vld [vmem:[#allocation2 + $0x8d0] sm:$0xff] }
 0x2e9   :  { %v1239_v14 = vpack.c.bf16 %v634_v54, %v632_v11  ;;  %v1275_v11 = vpack.c.bf16 %v754_v8, %v752_v7 }
 0x2eb   :  { %1200 = vmatpush1.bf16.msra.mxu0 %v1199_v16  ;;  %v636_v16 = vld [vmem:[#allocation2 + $0x928] sm:$0xff] }
 0x2ec   :  { %1202 = vmatprep.subr.bf16.mxu0 %v1201_v17  ;;  %v638_v17 = vld [vmem:[#allocation2 + $0x980] sm:$0xff] }
 0x2ed   :  { %v1243_v20 = vpack.c.bf16 %v638_v17, %v636_v16  ;;  %v1279_v16 = vpack.c.bf16 %v758_v13, %v756_v12  ;;  %v794_v12 = vld [vmem:[#allocation2 + $0xaf0] sm:$0xff] }
 0x2ef   :  { %1204 = vmatpush1.bf16.msra.mxu0 %v1203_v22  ;;  %v640_v22 = vld [vmem:[#allocation2 + $0x9d8] sm:$0xff] }
 0x2f0   :  { %1206 = vmatprep.subr.bf16.mxu0 %v1205_v23  ;;  %v642_v23 = vld [vmem:[#allocation2 + $0xa30] sm:$0xff] }
 0x2f1   :  { %v1247_v24 = vpack.c.bf16 %v642_v23, %v640_v22  ;;  %v1283_v22 = vpack.c.bf16 %v762_v19, %v760_v18 }
 0x2f3   :  { %1208 = vmatpush1.bf16.msra.mxu0 %v1207_v28 }
 0x2f4   :  { %1210 = vmatprep.subr.bf16.mxu0 %v1209_v29  ;;  %v645_v29 = vld [vmem:[#allocation2 + $0xa90] sm:$0xff] }
 0x2f5   :  { %v1249_v31 = vpack.c.bf16 %v647_v30, %v645_v29  ;;  %v768_v30 = vld [vmem:[#allocation2 + $0x678] sm:$0xff] }
 0x2f7   :  { %1212 = vmatpush1.bf16.msra.mxu0 %v1211_v34  ;;  %v1251_v34 = vpack.c.bf16 %v646_v33, %v644_v32  ;;  %v773_v32 = vld [vmem:[#allocation2 + $0x730] sm:$0xff]  ;;  %v775_v33 = vld [vmem:[#allocation2 + $0x788] sm:$0xff] }
 0x2f8   :  { %1214 = vmatprep.subr.bf16.mxu0 %v1213_v35  ;;  %v733_v35 = vld [vmem:[#allocation2 + $0x50] sm:$0xff] }
 0x2f9   :  { %v1253_v38 = vpack.c.bf16 %v735_v36, %v733_v35  ;;  %v1293_v35 = vpack.c.bf16 %v775_v33, %v773_v32  ;;  %v772_v36 = vld [vmem:[#allocation2 + $0x728] sm:$0xff] }
 0x2fb   :  { %1216 = vmatpush1.bf16.msra.mxu0 %v1215_v40  ;;  %v737_v40 = vld [vmem:[#allocation2 + $0x100] sm:$0xff]  ;;  %1254 = vmatprep.subr.bf16.mxu1 %v1253_v38 }
 0x2fc   :  { %1218 = vmatprep.subr.bf16.mxu0 %v1217_v41  ;;  %v739_v41 = vld [vmem:[#allocation2 + $0x158] sm:$0xff]  ;;  %v777_v38 = vld [vmem:[#allocation2 + $0x7e0] sm:$0xff] }
 0x2fd   :  { %v1257_v43 = vpack.c.bf16 %v739_v41, %v737_v40  ;;  %v1295_v40 = vpack.c.bf16 %v774_v37, %v772_v36  ;;  %v1297_v41 = vpack.c.bf16 %v779_v39, %v777_v38 }
 0x2ff   :  { %1220 = vmatpush1.bf16.msra.mxu0 %v1219_v46  ;;  %v741_v46 = vld [vmem:[#allocation2 + $0x1b0] sm:$0xff] }
 0x300   :  { %1222 = vmatprep.subr.bf16.mxu0 %v1221_v47  ;;  %v743_v47 = vld [vmem:[#allocation2 + $0x208] sm:$0xff] }
 0x301   :  { %v1261_v49 = vpack.c.bf16 %v743_v47, %v741_v46  ;;  %v1301_v47 = vpack.c.bf16 %v783_v45, %v781_v44 }
 0x303   :  { %1224 = vmatpush1.bf16.msra.mxu0 %v1223_v55  ;;  %v745_v55 = vld [vmem:[#allocation2 + $0x260] sm:$0xff] }
 0x304   :  { %1226 = vmatprep.subr.bf16.mxu0 %v1225_v52  ;;  %v747_v52 = vld [vmem:[#allocation2 + $0x2b8] sm:$0xff] }
 0x305   :  { %v1265_v56 = vpack.c.bf16 %v747_v52, %v745_v55  ;;  %v1305_v52 = vpack.c.bf16 %v787_v51, %v785_v50 }
 0x307   :  { %1228 = vmatpush1.bf16.msra.mxu0 %v1227_v61  ;;  %v749_v61 = vld [vmem:[#allocation2 + $0x310] sm:$0xff] }
 0x308   :  { %1230 = vmatprep.subr.bf16.mxu0 %v1229_v62  ;;  %v751_v62 = vld [vmem:[#allocation2 + $0x368] sm:$0xff] }
 0x309   :  { %v1269_v0 = vpack.c.bf16 %v751_v62, %v749_v61  ;;  %v1309_v62 = vpack.c.bf16 %v791_v60, %v789_v58 }
 0x30b   :  { %1232 = vmatpush1.bf16.msra.mxu0 %v1231_v3  ;;  %v753_v3 = vld [vmem:[#allocation2 + $0x3c0] sm:$0xff] }
 0x30c   :  { %1234 = vmatprep.subr.bf16.mxu0 %v1233_v4  ;;  %v755_v4 = vld [vmem:[#allocation2 + $0x418] sm:$0xff] }
 0x30d   :  { %v1273_v6 = vpack.c.bf16 %v755_v4, %v753_v3  ;;  %v510_v3 = vrot.slane %v501_v2, %v1403_v59  ;;  %v506_v4 = vrot.slane %v501_v2, %v1401_v57 }
 0x30f   :  { %1236 = vmatpush1.bf16.msra.mxu0 %v1235_v9  ;;  %v757_v9 = vld [vmem:[#allocation2 + $0x470] sm:$0xff] }
 0x310   :  { %1238 = vmatprep.subr.bf16.mxu0 %v1237_v10  ;;  %v759_v10 = vld [vmem:[#allocation2 + $0x4c8] sm:$0xff] }
 0x311   :  { %v1277_v54 = vpack.c.bf16 %v759_v10, %v757_v9  ;;  %v793_v9 = vld [vmem:[#allocation2 + $0xaa0] sm:$0xff]  ;;  %v795_v10 = vld [vmem:[#allocation2 + $0xaf8] sm:$0xff] }
 0x313   :  { %1240 = vmatpush1.bf16.msra.mxu0 %v1239_v14  ;;  %v761_v14 = vld [vmem:[#allocation2 + $0x520] sm:$0xff] }
 0x314   :  { %1242 = vmatprep.subr.bf16.mxu0 %v1241_v15  ;;  %v763_v15 = vld [vmem:[#allocation2 + $0x578] sm:$0xff] }
 0x315   :  { %v1281_v17 = vpack.c.bf16 %v763_v15, %v761_v14  ;;  %v649_v14 = vld [vmem:[#allocation2 + $0xb38] ss:$8 sm:$0x3] }
 0x316   :  { %v658_v15 = vrot.slane %v649_v14, %v1403_v59 }
 0x317   :  { %1244 = vmatpush1.bf16.msra.mxu0 %v1243_v20  ;;  %v765_v20 = vld [vmem:[#allocation2 + $0x5d0] sm:$0xff] }
 0x318   :  { %1246 = vmatprep.subr.bf16.mxu0 %v1245_v21  ;;  %v767_v21 = vld [vmem:[#allocation2 + $0x628] sm:$0xff] }
 0x319   :  { %v1285_v23 = vpack.c.bf16 %v767_v21, %v765_v20  ;;  %v797_v21 = vld [vmem:[#allocation2 + $0xb48] ss:$8 sm:$0x3] }
 0x31b   :  { %1248 = vmatpush1.bf16.msra.mxu0 %v1247_v24  ;;  %v764_v24 = vld [vmem:[#allocation2 + $0x5c8] sm:$0xff] }
 0x31c   :  { %1250 = vmatprep.subr.bf16.mxu0 %v1249_v31  ;;  %v770_v31 = vld [vmem:[#allocation2 + $0x6d0] sm:$0xff] }
 0x31f   :  { %1252 = vmatpush1.bf16.msra.mxu0 %v1251_v34  ;;  %v1291_v34 = vpack.c.bf16 %v770_v31, %v768_v30 }
 0x3b5   :  { %v464_v26 = vpop.f32.mrb[2].mxu0 }
 0x3b6   :  { %v465_v27 = vadd.f32 %v464_v26, %v397_v25  ;;  %v1032_v28 = vpop.f32.mrb[3].mxu0  ;;  %v766_v25 = vld [vmem:[#allocation2 + $0x620] sm:$0xff] }
 0x3b7   :  { %v769_v26 = vld [vmem:[#allocation2 + $0x680] sm:$0xff]  ;;  %v1287_v28 = vpack.c.bf16 %v766_v25, %v764_v24 }
 0x3b8   :  { %578 = vmatmul.mubr.f32.vlgmr.msra.gmra.mrb[4].mxu1 %v465_v27  ;;  %v771_v27 = vld [vmem:[#allocation2 + $0x6d8] sm:$0xff] }
 0x3b9   :  { %1256 = vmatpush1.bf16.msra.mxu1 %v1255_v42  ;;  %v1289_v29 = vpack.c.bf16 %v771_v27, %v769_v26  ;;  %v776_v42 = vld [vmem:[#allocation2 + $0x7d8] sm:$0xff] }
 0x3ba   :  { %1258 = vmatprep.subr.bf16.mxu1 %v1257_v43  ;;  %v778_v43 = vld [vmem:[#allocation2 + $0x830] sm:$0xff] }
 0x3bb   :  { %v1299_v46 = vpack.c.bf16 %v778_v43, %v776_v42 }
 0x3bd   :  { %1260 = vmatpush1.bf16.msra.mxu1 %v1259_v48  ;;  %v780_v48 = vld [vmem:[#allocation2 + $0x888] sm:$0xff] }
 0x3be   :  { %1262 = vmatprep.subr.bf16.mxu1 %v1261_v49  ;;  %v782_v49 = vld [vmem:[#allocation2 + $0x8e0] sm:$0xff] }
 0x3bf   :  { %v1303_v55 = vpack.c.bf16 %v782_v49, %v780_v48 }
 0x3c1   :  { %1264 = vmatpush1.bf16.msra.mxu1 %v1263_v53  ;;  %v784_v53 = vld [vmem:[#allocation2 + $0x938] sm:$0xff] }
 0x3c2   :  { %1266 = vmatprep.subr.bf16.mxu1 %v1265_v56  ;;  %v786_v56 = vld [vmem:[#allocation2 + $0x990] sm:$0xff] }
 0x3c3   :  { %v1307_v61 = vpack.c.bf16 %v786_v56, %v784_v53 }
 0x3c5   :  { %1268 = vmatpush1.bf16.msra.mxu1 %v1267_v63  ;;  %v788_v63 = vld [vmem:[#allocation2 + $0x9e8] sm:$0xff] }
 0x3c6   :  { %1270 = vmatprep.subr.bf16.mxu1 %v1269_v0  ;;  %v790_v0 = vld [vmem:[#allocation2 + $0xa40] sm:$0xff] }
 0x3c7   :  { %v1311_v1 = vpack.c.bf16 %v790_v0, %v788_v63 }
 0x3c9   :  { %1272 = vmatpush1.bf16.msra.mxu1 %v1271_v5 }
 0x3ca   :  { %1274 = vmatprep.subr.bf16.mxu1 %v1273_v6 }
 0x3cd   :  { %1276 = vmatpush1.bf16.msra.mxu1 %v1275_v11  ;;  %v1313_v11 = vpack.c.bf16 %v795_v10, %v793_v9 }
 0x3ce   :  { %1278 = vmatprep.subr.bf16.mxu1 %v1277_v54  ;;  %v792_v54 = vld [vmem:[#allocation2 + $0xa98] sm:$0xff] }
 0x3cf   :  { %v1315_v13 = vpack.c.bf16 %v794_v12, %v792_v54 }
 0x3d1   :  { %1280 = vmatpush1.bf16.msra.mxu1 %v1279_v16  ;;  %v654_v16 = vrot.slane %v649_v14, %v1401_v57 }
 0x3d2   :  { %1282 = vmatprep.subr.bf16.mxu1 %v1281_v17 }
 0x3d5   :  { %1284 = vmatpush1.bf16.msra.mxu1 %v1283_v22  ;;  %v802_v22 = vrot.slane %v797_v21, %v1401_v57 }
 0x3d6   :  { %1286 = vmatprep.subr.bf16.mxu1 %v1285_v23  ;;  %v806_v23 = vrot.slane %v797_v21, %v1403_v59 }
 0x3d9   :  { %1288 = vmatpush1.bf16.msra.mxu1 %v1287_v28 }
 0x3da   :  { %1290 = vmatprep.subr.bf16.mxu1 %v1289_v29 }
 0x3dd   :  { %1292 = vmatpush1.bf16.msra.mxu1 %v1291_v34 }
 0x3de   :  { %1294 = vmatprep.subr.bf16.mxu1 %v1293_v35 }
 0x3e1   :  { %1296 = vmatpush1.bf16.msra.mxu1 %v1295_v40 }
 0x3e2   :  { %1298 = vmatprep.subr.bf16.mxu1 %v1297_v41 }
 0x3e5   :  { %1300 = vmatpush1.bf16.msra.mxu1 %v1299_v46 }
 0x3e6   :  { %1302 = vmatprep.subr.bf16.mxu1 %v1301_v47 }
 0x3e9   :  { %1304 = vmatpush1.bf16.msra.mxu1 %v1303_v55 }
 0x3ea   :  { %1306 = vmatprep.subr.bf16.mxu1 %v1305_v52 }
 0x3ed   :  { %1308 = vmatpush1.bf16.msra.mxu1 %v1307_v61 }
 0x3ee   :  { %1310 = vmatprep.subr.bf16.mxu1 %v1309_v62 }
 0x3f1   :  { %1312 = vmatpush1.bf16.msra.mxu1 %v1311_v1 }
 0x3f2   :  { %1314 = vmatprep.subr.bf16.mxu1 %v1313_v11 }
 0x3f5   :  { %1316 = vmatpush1.bf16.msra.mxu1 %v1315_v13 }
 0x48b   :  { %v579_v5 = vpop.f32.mrb[4].mxu1 }
 0x48c   :  { %v581_v6 = vpop.f32.mrb[5].mxu1  ;;  %v580_v8 = vadd.f32 %v579_v5, %v506_v4 }
 0x48d   :  { %v582_v7 = vadd.f32 %v581_v6, %v510_v3 }
 0x48f   :  { %725 = vmatprep.mubr.f32.mxu0 %v582_v7 }
 0x490   :  { %726 = vmatmul.mubr.f32.vlgmr.msra.gmra.mrb[4].mxu0 %v580_v8 }
 0x563   :  { %v727_v17 = vpop.f32.mrb[4].mxu0 }
 0x564   :  { %v729_v18 = vpop.f32.mrb[5].mxu0  ;;  %v728_v20 = vadd.f32 %v727_v17, %v654_v16 }
 0x565   :  { %v730_v19 = vadd.f32 %v729_v18, %v658_v15 }
 0x567   :  { %873 = vmatprep.mubr.f32.mxu1 %v730_v19 }
 0x568   :  { %874 = vmatmul.mubr.f32.vlgmr.msra.gmra.mrb[6].mxu1 %v728_v20 }
 0x63b   :  { %v875_v24 = vpop.f32.mrb[6].mxu1 }
 0x63c   :  { %v876_v25 = vadd.f32 %v875_v24, %v802_v22  ;;  %v877_v26 = vpop.f32.mrb[7].mxu1 }
 0x63d   :  { %v878_v27 = vadd.f32 %v877_v26, %v806_v23 }
 0x63e   :  { %880 = vst [vmem:[%s1444_s4] sm:$0xff] %v876_v25 }
 0x63f   :  { %881 = vst [vmem:[%s1444_s4 + $0x8] sm:$0xff] %v878_v27 }
 0x640   :  { %890 = vsyncpa [#allocation3], 1 }

</bundles_post_ra>
